<compile_context>
chip_gen: v5e
topology: v5e:2x2
jax: 0.10.0
libtpu: 0.0.40
codegen_flags: <defaults>
</compile_context>

<pallas_src>
import math

import jax
import jax.numpy as jnp
import numpy as np
from jax.experimental import pallas as pl
from jax.experimental.pallas import tpu as pltpu


# ----------------------------- kernels -------------------------------------


def _finish_softmax(logits, maskbias_ref, out_ref):
    """Masked row-softmax (axis=1) shared by both logit paths."""
    masked = logits + maskbias_ref[...].astype(jnp.float32)     # -inf where masked
    m = jnp.max(masked, axis=1, keepdims=True)
    e = jnp.exp(masked - m)
    denom = jnp.sum(e, axis=1, keepdims=True)
    inv = pl.reciprocal(denom, approx=True)                     # EUP slot (free-ish)
    inv = inv * (2.0 - denom * inv)                             # 1 Newton step -> ~f32
    out_ref[...] = (e * inv).astype(out_ref.dtype)


def softmax_decoder_kernel_mxu(x_ref, w_ref, maskbias_ref, out_ref):
    """Lane-dense MXU path.

    x_ref        : [TB, N*E]  flattened node embeddings (upcast after load)
    w_ref        : [N*E, N]   block-sparse Linear weight, resident in VMEM
    maskbias_ref : [TB, N]    additive 0 / -inf mask bias (bf16)
    out_ref      : [TB, N]    softmax probabilities (f32)
    """
    x = x_ref[...].astype(jnp.float32)
    logits = jnp.dot(x, w_ref[...], preferred_element_type=jnp.float32)  # [TB, N]
    _finish_softmax(logits, maskbias_ref, out_ref)


def softmax_decoder_kernel_vpu(x_ref, w_ref, maskbias_ref, out_ref):
    """VPU fallback for large N (block-sparse W would not fit in VMEM).

    x_ref : [TB, N, E]   w_ref : [1, 1, E]
    """
    x = x_ref[...].astype(jnp.float32)
    logits = jnp.sum(x * w_ref[...].astype(jnp.float32), axis=-1)        # [TB, N]
    _finish_softmax(logits, maskbias_ref, out_ref)


# --------------------------- tiling helpers ---------------------------------


def _round_up(v, m):
    return (v + m - 1) // m * m


def _vmem_capacity_bytes():
    """Physical VMEM of the current chip; conservative (v7x) fallback."""
    try:
        info = pltpu.get_tpu_info()
        return int(getattr(info, "vmem_capacity_bytes", 64 << 20))
    except Exception:
        return 64 << 20


def _pick_block_b(B, x_row_bytes, lane_n, mb_itemsize, resident_bytes,
                  budget_bytes, sub):
    """Largest batch block whose *padded*, double-buffered working set fits.

    x_row_bytes already includes lane (128) padding of the x block's last dim;
    lane_n is N rounded up to 128 lanes.
    """
    per_row = (2 * x_row_bytes                 # x block, double-buffered
               + 2 * lane_n * mb_itemsize      # mask bias block, double-buffered
               + 2 * lane_n * 4)               # out block (f32), double-buffered
    budget = max(budget_bytes - resident_bytes, 4 << 20)
    tb = budget // per_row
    if B >= 16:
        # >=2 grid steps so both v7x TensorCores get work; near-free on 1-TC chips.
        tb = min(tb, _round_up(pl.cdiv(B, 2), sub))
    if tb >= B:
        return B
    tb = max(sub, (tb // sub) * sub)           # keep sublane-aligned blocks
    return min(tb, B)


# ------------------------------ wrapper --------------------------------------


def softmax_decoder(x, weight, bias, demand, supply, node_mask,
                    block_b=None, force_vpu=False):
    """Reproduces SoftmaxDecoder.forward.

    x         : [B, N, E]   node embeddings, N = 1 + SH*S
    weight    : [1, E]      nn.Linear(emb, 1).weight
    bias      : [1]         nn.Linear(emb, 1).bias (unused: softmax-invariant)
    demand    : [B, S]      per-sku demand
    supply    : [B, SH, S]  per-shelf / per-sku supply
    node_mask : [B, 1+SH]   state.get_node_mask() (nonzero == masked)
    returns   : [B, N] softmax probabilities (float32)
    """
    del bias  # adds the same constant to every logit in a row -> no effect
    B, N, E = x.shape
    _, SH, S = supply.shape
    assert N == 1 + SH * S, "nodes must be 1 (depot) + shelves*skus"

    # ---- plain-JAX glue: fuse demand/supply/node_mask into one [B,N] bias ----
    combo_mask = (demand[:, None, :] * supply) < 1e-05            # [B, SH, S]
    shelf_mask = node_mask > 0                                    # [B, 1+SH]
    depot_mask = shelf_mask[:, :1]                                # [B, 1]
    mask = jnp.logical_or(shelf_mask[:, 1:, None], combo_mask)    # [B, SH, S]
    mask = jnp.concatenate([depot_mask, mask.reshape(B, SH * S)], axis=1)
    # bf16 side stream (half the bytes); -inf is exactly representable.
    mask_bias = jnp.where(mask, -jnp.inf, 0.0).astype(jnp.bfloat16)   # [B, N]

    x_item = x.dtype.itemsize
    sub = 16 if x_item < 4 else 8                 # sublane quantum for x's dtype
    lane_n = _round_up(N, 128)                    # mask / out lane padding
    w_bytes = _round_up(N * E, 8) * lane_n * 4    # padded resident block-sparse W
    use_mxu = (not force_vpu) and (w_bytes <= (8 << 20))

    if use_mxu:
        x_op = x.reshape(B, N * E)                # lane-dense, contiguous (free)
        # Block-sparse weight: W[n*E + e, n] = w[e]
        w_op = (jnp.eye(N, dtype=jnp.float32)[:, None, :]
                * weight.reshape(1, E, 1).astype(jnp.float32)).reshape(N * E, N)
        x_row = _round_up(N * E, 128) * x_item    # padded bytes per batch row
        resident = w_bytes
        kernel = softmax_decoder_kernel_mxu
        make_x_spec = lambda tb: pl.BlockSpec((tb, N * E), lambda i: (i, 0))
        w_spec = pl.BlockSpec((N * E, N), lambda i: (0, 0))       # resident
    else:
        x_op = x
        w_op = weight.reshape(1, 1, E).astype(jnp.float32)
        x_row = _round_up(N, sub) * _round_up(E, 128) * x_item
        resident = 8 * _round_up(E, 128) * 4
        kernel = softmax_decoder_kernel_vpu
        make_x_spec = lambda tb: pl.BlockSpec((tb, N, E), lambda i: (i, 0, 0))
        w_spec = pl.BlockSpec((1, 1, E), lambda i: (0, 0, 0))

    vmem_cap = _vmem_capacity_bytes()
    # ~25 MiB on v7x (64 MiB VMEM), ~51 MiB on v5e/v6e (128 MiB VMEM).
    budget = max(16 << 20, (vmem_cap * 2) // 5)

    if block_b is not None:
        tb = min(block_b, B)
    else:
        tb = _pick_block_b(B, x_row, lane_n, mask_bias.dtype.itemsize,
                           resident, budget, sub)
    grid = (pl.cdiv(B, tb),)

    # Padding-aware per-step working set -> explicit scoped-VMEM limit.
    step_bytes = (2 * _round_up(tb, sub) * x_row
                  + 2 * _round_up(tb, 16) * lane_n * mask_bias.dtype.itemsize
                  + 2 * _round_up(tb, 8) * lane_n * 4
                  + resident)
    vmem_limit = int(min(vmem_cap * 3 // 4,
                         max(4 << 20, step_bytes + step_bytes // 2)))

    cost = pl.CostEstimate(
        flops=2 * B * N * E * (N if use_mxu else 1) + 8 * B * N,
        transcendentals=B * N + B,
        bytes_accessed=(B * N * E * x_item
                        + B * N * mask_bias.dtype.itemsize
                        + B * N * 4
                        + int(np.prod(w_op.shape)) * 4))

    return pl.pallas_call(
        kernel,
        out_shape=jax.ShapeDtypeStruct((B, N), jnp.float32),
        grid=grid,
        in_specs=[make_x_spec(tb),
                  w_spec,
                  pl.BlockSpec((tb, N), lambda i: (i, 0))],
        out_specs=pl.BlockSpec((tb, N), lambda i: (i, 0)),
        compiler_params=pltpu.CompilerParams(
            dimension_semantics=("parallel",),
            vmem_limit_bytes=vmem_limit),
        cost_estimate=cost,
    )(x_op, w_op, mask_bias)


# ----------------------------- reference -------------------------------------


def reference_forward(x, weight, bias, demand, supply, node_mask):
    """Pure-JAX transcription of the PyTorch forward (exact f32 VPU math)."""
    B = x.shape[0]
    xf = x.astype(jnp.float32)
    logits = jnp.sum(xf * weight[0].astype(jnp.float32), axis=-1) + bias.astype(jnp.float32)
    mask_all_comb = demand[:, None, :] * supply < 1e-05
    shelf_mask = node_mask > 0
    depot_mask = shelf_mask[:, :1]
    mask = jnp.logical_or(shelf_mask[:, 1:, None], mask_all_comb)
    mask = mask.reshape(B, -1)
    mask = jnp.concatenate([depot_mask, mask], axis=1)
    logits = jnp.where(mask, -jnp.inf, logits)
    return jax.nn.softmax(logits, axis=1)


# ------------------------------- tests ---------------------------------------


def _make_inputs(key, B, SH, S, E):
    N = 1 + SH * S
    kw, kb, kx, kd, ks = jax.random.split(key, 5)
    bound = 1.0 / math.sqrt(E)   # nn.Linear(embedding_dim, 1) default init range
    weight = jax.random.uniform(kw, (1, E), jnp.float32, -bound, bound)
    bias = jax.random.uniform(kb, (1,), jnp.float32, -bound, bound)
    x = jax.random.normal(kx, (B, N, E), jnp.float32)
    demand = jax.random.uniform(kd, (B, S), jnp.float32, 0.1, 1.0)
    supply = jax.random.uniform(ks, (B, SH, S), jnp.float32, 0.1, 1.0)
    # Force zero-supply combos so the combo-mask path is exercised.
    supply = supply.at[:, 0, 0].set(0.0)
    supply = supply.at[B - 1, SH - 1, S - 1].set(0.0)
    # Node mask: depot open; shelf 2 masked everywhere (nonzero == masked).
    node_mask = jnp.zeros((B, 1 + SH), jnp.int32).at[:, 2].set(1)
    return x, weight, bias, demand, supply, node_mask


def _check(probs, ref, rtol, atol):
    probs = np.asarray(jax.block_until_ready(probs))
    ref = np.asarray(ref)
    np.testing.assert_allclose(probs, ref, rtol=rtol, atol=atol)
    np.testing.assert_allclose(probs.sum(axis=1), np.ones(probs.shape[0]),
                               rtol=1e-4, atol=1e-4)


if __name__ == "__main__":
    # Logit matmul may execute at MXU bf16-pass precision under default
    # jnp.dot precision, so the value check on the MXU path is moderately loose;
    # row sums are checked tightly (normalization is exact post-Newton).
    MXU_RTOL, MXU_ATOL = 2e-2, 1e-4

    SH, S, E = 3, 5, 32

    # --- small "module-shaped" test: B=2, shelves=3, skus=5, emb=32 -----------
    key = jax.random.PRNGKey(0)
    B = 2
    x, weight, bias, demand, supply, node_mask = _make_inputs(key, B, SH, S, E)
    probs = softmax_decoder(x, weight, bias, demand, supply, node_mask)
    ref = reference_forward(x, weight, bias, demand, supply, node_mask)
    _check(probs, ref, MXU_RTOL, MXU_ATOL)

    # --- multi-block grid test: B=48, forced batch block of 16 ----------------
    key2 = jax.random.PRNGKey(1)
    B2 = 48
    x2, w2, b2, d2, s2, nm2 = _make_inputs(key2, B2, SH, S, E)
    probs2 = softmax_decoder(x2, w2, b2, d2, s2, nm2, block_b=16)
    ref2 = reference_forward(x2, w2, b2, d2, s2, nm2)
    _check(probs2, ref2, MXU_RTOL, MXU_ATOL)

    # --- bf16-x path (auto block sizing, >=2 grid steps) -----------------------
    key3 = jax.random.PRNGKey(2)
    B3 = 32
    x3, w3, b3, d3, s3, nm3 = _make_inputs(key3, B3, SH, S, E)
    x3b = x3.astype(jnp.bfloat16)
    probs3 = softmax_decoder(x3b, w3, b3, d3, s3, nm3)
    ref3 = reference_forward(x3b, w3, b3, d3, s3, nm3)
    _check(probs3, ref3, MXU_RTOL, MXU_ATOL)

    # --- VPU fallback path (large-N regime), exact f32 logits -----------------
    probs4 = softmax_decoder(x, weight, bias, demand, supply, node_mask,
                             force_vpu=True)
    _check(probs4, ref, 1e-3, 1e-6)

    print("KERNEL_OK")
</pallas_src>

<mosaic_0001>
module attributes {stable_mosaic.version = 11 : i64} {
  func.func @softmax_decoder_kernel_mxu(%arg0: i32, %arg1: memref<2x512xf32, #tpu.memory_space<vmem>>, %arg2: memref<512x16xf32, #tpu.memory_space<vmem>>, %arg3: memref<2x16xbf16, #tpu.memory_space<vmem>>, %arg4: memref<2x16xf32, #tpu.memory_space<vmem>>) attributes {dimension_semantics = [#tpu.dimension_semantics<parallel>], iteration_bounds = array<i64: 1>, scalar_prefetch = 0 : i64, scratch_operands = 0 : i64, tpu.core_type = #tpu.core_type<tc>, window_params = [{transform_indices = @transform_0, window_bounds = array<i64: 2, 512>}, {pipeline_mode = #tpu.pipeline_mode<synchronous>, transform_indices = @transform_1, window_bounds = array<i64: 512, 16>}, {transform_indices = @transform_2, window_bounds = array<i64: 2, 16>}, {transform_indices = @transform_3, window_bounds = array<i64: 2, 16>}]} {
    %c0 = arith.constant 0 : index
    %c0_0 = arith.constant 0 : index
    %0 = vector.load %arg1[%c0, %c0_0] : memref<2x512xf32, #tpu.memory_space<vmem>>, vector<2x512xf32>
    %c0_1 = arith.constant 0 : index
    %c0_2 = arith.constant 0 : index
    %1 = vector.load %arg2[%c0_1, %c0_2] : memref<512x16xf32, #tpu.memory_space<vmem>>, vector<512x16xf32>
    %cst = arith.constant dense<0.000000e+00> : vector<2x16xf32>
    %2 = tpu.matmul %0, %1, %cst {dimension_numbers = #tpu.dot_dimension_numbers<[1], [0], [0], [1], [0, 0, 1, 1], [], []>} : vector<2x512xf32>, vector<512x16xf32>, vector<2x16xf32> -> vector<2x16xf32>
    %c0_3 = arith.constant 0 : index
    %c0_4 = arith.constant 0 : index
    %3 = vector.load %arg3[%c0_3, %c0_4] : memref<2x16xbf16, #tpu.memory_space<vmem>>, vector<2x16xbf16>
    %4 = arith.extf %3 : vector<2x16xbf16> to vector<2x16xf32>
    %5 = arith.addf %2, %4 : vector<2x16xf32>
    %cst_5 = arith.constant dense<0xFF800000> : vector<2xf32>
    %6 = vector.multi_reduction <maximumf>, %5, %cst_5 [1] : vector<2x16xf32> to vector<2xf32>
    %7 = vector.shape_cast %6 : vector<2xf32> to vector<2x1xf32>
    %8 = vector.broadcast %7 : vector<2x1xf32> to vector<2x16xf32>
    %9 = arith.subf %5, %8 : vector<2x16xf32>
    %10 = math.exp %9 : vector<2x16xf32>
    %cst_6 = arith.constant dense<0.000000e+00> : vector<2xf32>
    %11 = vector.multi_reduction <add>, %10, %cst_6 [1] : vector<2x16xf32> to vector<2xf32>
    %12 = vector.shape_cast %11 : vector<2xf32> to vector<2x1xf32>
    %13 = tpu.reciprocal %12 {approx = true} : vector<2x1xf32> -> vector<2x1xf32>
    %14 = arith.mulf %12, %13 : vector<2x1xf32>
    %cst_7 = arith.constant 2.000000e+00 : f32
    %15 = vector.broadcast %cst_7 : f32 to vector<2x1xf32>
    %16 = arith.subf %15, %14 : vector<2x1xf32>
    %17 = arith.mulf %13, %16 : vector<2x1xf32>
    %18 = vector.broadcast %17 : vector<2x1xf32> to vector<2x16xf32>
    %19 = arith.mulf %10, %18 : vector<2x16xf32>
    %c0_8 = arith.constant 0 : index
    %c0_9 = arith.constant 0 : index
    %20 = vector.load %arg4[%c0_8, %c0_9] : memref<2x16xf32, #tpu.memory_space<vmem>>, vector<2x16xf32>
    tpu.vector_store %arg4[%c0_8, %c0_9], %19 {strides = array<i32>} : memref<2x16xf32, #tpu.memory_space<vmem>>, vector<2x16xf32>,
    return
  }
  func.func @transform_0(%arg0: i32) -> (i32, i32) {
    %c0_i32 = arith.constant 0 : i32
    %c0_i32_0 = arith.constant 0 : i32
    return %arg0, %c0_i32 : i32, i32
  }
  func.func @transform_1(%arg0: i32) -> (i32, i32) {
    %c0_i32 = arith.constant 0 : i32
    %c0_i32_0 = arith.constant 0 : i32
    %c0_i32_1 = arith.constant 0 : i32
    return %c0_i32, %c0_i32_0 : i32, i32
  }
  func.func @transform_2(%arg0: i32) -> (i32, i32) {
    %c0_i32 = arith.constant 0 : i32
    %c0_i32_0 = arith.constant 0 : i32
    return %arg0, %c0_i32 : i32, i32
  }
  func.func @transform_3(%arg0: i32) -> (i32, i32) {
    %c0_i32 = arith.constant 0 : i32
    %c0_i32_0 = arith.constant 0 : i32
    return %arg0, %c0_i32 : i32, i32
  }
}

</mosaic_0001>

<bundles_post_ra>
// kernel: tpu_custom_call.1
= control target key start
LH: loop header
LB: loop body
LE: loop exit
PB: predicated region body
PF: predicated region fallthrough
CT: control target
= control target key end

     0   :  { %s460_s0 = inlined_call_operand.vmem [shape: f32[2,512], index: 0, kind: input, shape index: {}]   ;;  %s461_s1 = inlined_call_operand.vmem [shape: f32[512,16], index: 1, kind: input, shape index: {}]   ;;  %s462_s2 = inlined_call_operand.vmem [shape: bf16[2,16], index: 2, kind: input, shape index: {}]   ;;  %s463_s3 = inlined_call_operand.hbm [shape: f32[2,16], index: 3, kind: output, shape index: {}]  }
   0x1   :  { %v63_v0 = vld [vmem:[%s461_s1 + $0x178] sm:$0xff]  ;;  %v62_v2 = vld [vmem:[%s461_s1 + $0x170] sm:$0xff]  ;;  %v61_v6 = vld [vmem:[%s461_s1 + $0x168] sm:$0xff] }
   0x2   :  { %v31_v1 = vld [vmem:[%s461_s1 + $0x78] sm:$0xff]  ;;  %132 = vmatpush.msra.mxu2 %v63_v0  ;;  %v30_v4 = vld [vmem:[%s461_s1 + $0x70] sm:$0xff]  ;;  %v29_v8 = vld [vmem:[%s461_s1 + $0x68] sm:$0xff] }
   0x3   :  { %92 = vmatpush.msra.mxu0 %v31_v1  ;;  %v79_v3 = vld [vmem:[%s461_s1 + $0x1f8] sm:$0xff]  ;;  %v78_v7 = vld [vmem:[%s461_s1 + $0x1f0] sm:$0xff]  ;;  %v77_v10 = vld [vmem:[%s461_s1 + $0x1e8] sm:$0xff] }
   0x4   :  { %v47_v5 = vld [vmem:[%s461_s1 + $0xf8] sm:$0xff]  ;;  %152 = vmatpush.msra.mxu3 %v79_v3  ;;  %133 = vmatpush.msra.mxu2 %v62_v2  ;;  %v46_v9 = vld [vmem:[%s461_s1 + $0xf0] sm:$0xff]  ;;  %v60_v11 = vld [vmem:[%s461_s1 + $0x160] sm:$0xff] }
   0x5   :  { %112 = vmatpush.msra.mxu1 %v47_v5  ;;  %93 = vmatpush.msra.mxu0 %v30_v4  ;;  %v28_v12 = vld [vmem:[%s461_s1 + $0x60] sm:$0xff]  ;;  %v45_v13 = vld [vmem:[%s461_s1 + $0xe8] sm:$0xff]  ;;  %v59_v16 = vld [vmem:[%s461_s1 + $0x158] sm:$0xff] }
   0x6   :  { %153 = vmatpush.msra.mxu3 %v78_v7  ;;  %134 = vmatpush.msra.mxu2 %v61_v6  ;;  %v76_v14 = vld [vmem:[%s461_s1 + $0x1e0] sm:$0xff]  ;;  %v27_v17 = vld [vmem:[%s461_s1 + $0x58] sm:$0xff]  ;;  %v58_v20 = vld [vmem:[%s461_s1 + $0x150] sm:$0xff] }
   0x7   :  { %113 = vmatpush.msra.mxu1 %v46_v9  ;;  %94 = vmatpush.msra.mxu0 %v29_v8  ;;  %v44_v15 = vld [vmem:[%s461_s1 + $0xe0] sm:$0xff]  ;;  %v75_v18 = vld [vmem:[%s461_s1 + $0x1d8] sm:$0xff]  ;;  %v26_v21 = vld [vmem:[%s461_s1 + $0x50] sm:$0xff] }
   0x8   :  { %154 = vmatpush.msra.mxu3 %v77_v10  ;;  %135 = vmatpush.msra.mxu2 %v60_v11  ;;  %v43_v19 = vld [vmem:[%s461_s1 + $0xd8] sm:$0xff]  ;;  %v74_v22 = vld [vmem:[%s461_s1 + $0x1d0] sm:$0xff]  ;;  %v57_v24 = vld [vmem:[%s461_s1 + $0x148] sm:$0xff] }
   0x9   :  { %114 = vmatpush.msra.mxu1 %v45_v13  ;;  %95 = vmatpush.msra.mxu0 %v28_v12  ;;  %v42_v23 = vld [vmem:[%s461_s1 + $0xd0] sm:$0xff]  ;;  %v25_v25 = vld [vmem:[%s461_s1 + $0x48] sm:$0xff]  ;;  %v56_v28 = vld [vmem:[%s461_s1 + $0x140] sm:$0xff] }
   0xa   :  { %155 = vmatpush.msra.mxu3 %v76_v14  ;;  %136 = vmatpush.msra.mxu2 %v59_v16  ;;  %v73_v26 = vld [vmem:[%s461_s1 + $0x1c8] sm:$0xff]  ;;  %v24_v29 = vld [vmem:[%s461_s1 + $0x40] sm:$0xff]  ;;  %v55_v32 = vld [vmem:[%s461_s1 + $0x138] sm:$0xff] }
   0xb   :  { %115 = vmatpush.msra.mxu1 %v44_v15  ;;  %96 = vmatpush.msra.mxu0 %v27_v17  ;;  %v41_v27 = vld [vmem:[%s461_s1 + $0xc8] sm:$0xff]  ;;  %v72_v30 = vld [vmem:[%s461_s1 + $0x1c0] sm:$0xff]  ;;  %v23_v33 = vld [vmem:[%s461_s1 + $0x38] sm:$0xff] }
   0xc   :  { %156 = vmatpush.msra.mxu3 %v75_v18  ;;  %137 = vmatpush.msra.mxu2 %v58_v20  ;;  %v40_v31 = vld [vmem:[%s461_s1 + $0xc0] sm:$0xff]  ;;  %v71_v34 = vld [vmem:[%s461_s1 + $0x1b8] sm:$0xff]  ;;  %v54_v36 = vld [vmem:[%s461_s1 + $0x130] sm:$0xff] }
   0xd   :  { %116 = vmatpush.msra.mxu1 %v43_v19  ;;  %97 = vmatpush.msra.mxu0 %v26_v21  ;;  %v39_v35 = vld [vmem:[%s461_s1 + $0xb8] sm:$0xff]  ;;  %v22_v37 = vld [vmem:[%s461_s1 + $0x30] sm:$0xff]  ;;  %v53_v40 = vld [vmem:[%s461_s1 + $0x128] sm:$0xff] }
   0xe   :  { %157 = vmatpush.msra.mxu3 %v74_v22  ;;  %138 = vmatpush.msra.mxu2 %v57_v24  ;;  %v70_v38 = vld [vmem:[%s461_s1 + $0x1b0] sm:$0xff]  ;;  %v21_v41 = vld [vmem:[%s461_s1 + $0x28] sm:$0xff]  ;;  %v52_v44 = vld [vmem:[%s461_s1 + $0x120] sm:$0xff] }
   0xf   :  { %117 = vmatpush.msra.mxu1 %v42_v23  ;;  %98 = vmatpush.msra.mxu0 %v25_v25  ;;  %v38_v39 = vld [vmem:[%s461_s1 + $0xb0] sm:$0xff]  ;;  %v69_v42 = vld [vmem:[%s461_s1 + $0x1a8] sm:$0xff]  ;;  %v20_v45 = vld [vmem:[%s461_s1 + $0x20] sm:$0xff] }
  0x10   :  { %158 = vmatpush.msra.mxu3 %v73_v26  ;;  %139 = vmatpush.msra.mxu2 %v56_v28  ;;  %v37_v43 = vld [vmem:[%s461_s1 + $0xa8] sm:$0xff]  ;;  %v15_v46 = vld [vmem:[%s460_s0] sm:$0xff]  ;;  %v51_v49 = vld [vmem:[%s461_s1 + $0x118] sm:$0xff] }
  0x11   :  { %118 = vmatpush.msra.mxu1 %v41_v27  ;;  %99 = vmatpush.msra.mxu0 %v24_v29  ;;  %v68_v47 = vld [vmem:[%s461_s1 + $0x1a0] sm:$0xff]  ;;  %83 = vst [vmem:[#allocation1] ss:$4 sm:$0xff] %v15_v46  ;;  %v19_v50 = vld [vmem:[%s461_s1 + $0x18] sm:$0xff] }
  0x12   :  { %159 = vmatpush.msra.mxu3 %v72_v30  ;;  %140 = vmatpush.msra.mxu2 %v55_v32  ;;  %v36_v48 = vld [vmem:[%s461_s1 + $0xa0] sm:$0xff] }
  0x13   :  { %119 = vmatpush.msra.mxu1 %v40_v31  ;;  %100 = vmatpush.msra.mxu0 %v23_v33 }
  0x14   :  { %160 = vmatpush.msra.mxu3 %v71_v34  ;;  %141 = vmatpush.msra.mxu2 %v54_v36 }
  0x15   :  { %120 = vmatpush.msra.mxu1 %v39_v35  ;;  %101 = vmatpush.msra.mxu0 %v22_v37 }
  0x16   :  { %161 = vmatpush.msra.mxu3 %v70_v38  ;;  %142 = vmatpush.msra.mxu2 %v53_v40 }
  0x17   :  { %121 = vmatpush.msra.mxu1 %v38_v39  ;;  %102 = vmatpush.msra.mxu0 %v21_v41 }
  0x18   :  { %162 = vmatpush.msra.mxu3 %v69_v42 }
  0x19   :  { %122 = vmatpush.msra.mxu1 %v37_v43 }
  0x1a   :  { %8 = vsyncpa [#allocation3], 0  ;;  %143 = vmatpush.msra.mxu2 %v52_v44  ;;  %103 = vmatpush.msra.mxu0 %v20_v45  ;;  %v67_v51 = vld [vmem:[%s461_s1 + $0x198] sm:$0xff]  ;;  %v50_v53 = vld [vmem:[%s461_s1 + $0x110] sm:$0xff]  ;;  %vm172_vm0 = vcmask 123904   ;;  %s195_s9 = sshll.u32 %s463_s3, 4  ;;  %s196_s9 = int_to_ptr.hbm [resolvable:$true] %s195_s9 }
  0x1b   :  { %v35_v52 = vld [vmem:[%s461_s1 + $0x98] sm:$0xff]  ;;  %163 = vmatpush.msra.mxu3 %v68_v47  ;;  %123 = vmatpush.msra.mxu1 %v36_v48  ;;  %v18_v54 = vld [vmem:[%s461_s1 + $0x10] sm:$0xff]  ;;  %v49_v57 = vld [vmem:[%s461_s1 + $0x108] sm:$0xff] }
  0x1c   :  { %144 = vmatpush.msra.mxu2 %v51_v49  ;;  %104 = vmatpush.msra.mxu0 %v19_v50  ;;  %v66_v55 = vld [vmem:[%s461_s1 + $0x190] sm:$0xff]  ;;  %v17_v58 = vld [vmem:[%s461_s1 + $0x8] sm:$0xff]  ;;  %v48_v61 = vld [vmem:[%s461_s1 + $0x100] sm:$0xff] }
  0x1d   :  { %v34_v56 = vld [vmem:[%s461_s1 + $0x90] sm:$0xff]  ;;  %164 = vmatpush.msra.mxu3 %v67_v51  ;;  %124 = vmatpush.msra.mxu1 %v35_v52  ;;  %v65_v59 = vld [vmem:[%s461_s1 + $0x188] sm:$0xff]  ;;  %v16_v62 = vld [vmem:[%s461_s1] sm:$0xff] }
  0x1e   :  { %145 = vmatpush.msra.mxu2 %v50_v53  ;;  %105 = vmatpush.msra.mxu0 %v18_v54  ;;  %v33_v60 = vld [vmem:[%s461_s1 + $0x88] sm:$0xff]  ;;  %v86_v63 = vld.sshfl [vmem:[#allocation1 + $0x10] sm:$0xff pattern:$0x73625140]  ;;  %v64_v0 = vld [vmem:[%s461_s1 + $0x180] sm:$0xff] }
  0x1f   :  { %165 = vmatpush.msra.mxu3 %v66_v55  ;;  %125 = vmatpush.msra.mxu1 %v34_v56  ;;  %v84_v1 = vld.sshfl [vmem:[#allocation1] sm:$0xff pattern:$0x73625140]  ;;  %v87_v2 = vld.sshfl [vmem:[#allocation1 + $0x18] sm:$0xff pattern:$0x73625140] }
  0x20   :  { %146 = vmatpush.msra.mxu2 %v49_v57  ;;  %106 = vmatpush.msra.mxu0 %v17_v58  ;;  %v32_v3 = vld [vmem:[%s461_s1 + $0x80] sm:$0xff]  ;;  %v85_v4 = vld.sshfl [vmem:[#allocation1 + $0x8] sm:$0xff pattern:$0x73625140]  ;;  %s235_s1 = smov [#allocation2]  }
  0x21   :  { %166 = vmatpush.msra.mxu3 %v65_v59  ;;  %126 = vmatpush.msra.mxu1 %v33_v60  ;;  %v80_v5 = vld [vmem:[%s462_s2] sm:$0x1]  ;;  %s193_s2 = sshll.u32 %s235_s1, 4  ;;  %s194_s2 = int_to_ptr.vmem [resolvable:$true] %s193_s2 }
  0x22   :  { %147 = vmatpush.msra.mxu2 %v48_v61  ;;  %107 = vmatpush.msra.mxu0 %v16_v62  ;;  %v81_v6 = vunpack.c.l.bf16 %v80_v5 }
  0x23   :  { %148 = vmatmul.f32.vlgmr.msra.gmra.mxu2 %v86_v63  ;;  %167 = vmatpush.msra.mxu3 %v64_v0 }
  0x24   :  { %108 = vmatmul.f32.vlgmr.msra.gmra.mxu0 %v84_v1  ;;  %168 = vmatmul.f32.vlgmr.msra.gmra.mxu3 %v87_v2 }
  0x25   :  { %127 = vmatpush.msra.mxu1 %v32_v3 }
  0x26   :  { %128 = vmatmul.f32.vlgmr.msra.gmra.mxu1 %v85_v4 }
  0xa1   :  { %v109_v7 = vpop.f32.mrf.mxu0 }
  0xa2   :  { %v110_v8 = vadd.f32 %v109_v7, %v81_v6 }
  0xa3   :  { %v129_v9 = vpop.f32.mrf.mxu1 }
  0xa4   :  { %v130_v10 = vadd.f32 %v129_v9, %v110_v8 }
  0xa6   :  { %v149_v11 = vpop.f32.mrf.mxu2 }
  0xa7   :  { %v150_v12 = vadd.f32 %v149_v11, %v130_v10  ;;  %v169_v13 = vpop.f32.mrf.mxu3 }
  0xa9   :  { %v170_v14 = vadd.f32 %v169_v13, %v150_v12 }
  0xab   :  { %v173_v15 = vsel %vm172_vm0, %v170_v14, -inf }
  0xac   :  { %174 = vmax.xlane.f32.xlu0 %v173_v15 }
 0x11f   :  { %v175_v16 = vpop.xlane.xlu0 %174 }
 0x120   :  { %v176_v17 = vsub.f32 %v170_v14, %v175_v16 }
 0x122   :  { %v177_v18 = vmul.f32 1.442695, %v176_v17 }
 0x124   :  { %205 = vpow2.f32 %v177_v18 }
 0x12a   :  { %v206_v19 = vpop.eup %205 }
 0x12b   :  { %v179_v20 = vsel %vm172_vm0, %v206_v19, 0.0 }
 0x12c   :  { %180 = vadd.xlane.f32.xlu0 %v179_v20 }
 0x19f   :  { %v181_v21 = vpop.xlane.xlu0 %180 }
 0x1a0   :  { %207 = vrcp.f32 %v181_v21 }
 0x1a6   :  { %v208_v22 = vpop.eup %207 }
 0x1a7   :  { %v183_v23 = vmul.f32 %v208_v22, %v181_v21 }
 0x1a9   :  { %v184_v24 = vsub.f32 2.0, %v183_v23 }
 0x1ab   :  { %v185_v25 = vmul.f32 %v208_v22, %v184_v24 }
 0x1ad   :  { %v186_v26 = vmul.f32 %v206_v19, %v185_v25 }
 0x1af   :  { %187 = vst.msk [vmem:[#allocation2] sm:$0x3] %vm172_vm0, %v186_v26 }
 0x1b0   :  { %198 = dma.vmem_to_hbm [thread:$0]  %s194_s2, 32, %s196_s9, [#allocation3]  }
 0x1b1   :  { %233 = dma.done.wait [#allocation3], 32  }
 0x1b2   :  { %234 = vsyncadd [#allocation3], 4294967264 }
 0x1b3   :  { %203 = vsyncpa [#allocation3], 1 }

</bundles_post_ra>
